<compile_context>
chip_gen: v5e
topology: v5e:2x2
jax: 0.10.0
libtpu: 0.0.40
codegen_flags: <defaults>
</compile_context>

<pallas_src>
import math
import numpy as np
import jax
import jax.numpy as jnp
from jax import lax
from jax.experimental import pallas as pl
from jax.experimental.pallas import tpu as pltpu


# ----------------------------------------------------------------------------- helpers
def _vmem_budget_bytes():
    """Generation-dependent VMEM budget: ~96 MiB on v5e/v6e (128 MiB physical VMEM),
    ~48 MiB on v7x (64 MiB).  Conservative 48 MiB fallback if the query fails."""
    cap = 64 * 1024 * 1024
    try:
        cap = int(pltpu.get_tpu_info().vmem_capacity_bytes)
    except Exception:
        pass
    return max(min((cap * 3) // 4, 100 * 1024 * 1024), 32 * 1024 * 1024)


def _pick_divisor_tile(n, candidates):
    for t in candidates:
        if t <= n and n % t == 0:
            return t
    return n


def _kv_block_spec(shape, index_map):
    """kv-streaming block with 3-deep pipelining; gracefully degrades to the default
    double-buffering if this Pallas build has no pipeline_mode kwarg."""
    try:
        return pl.BlockSpec(shape, index_map, pipeline_mode=pl.Buffered(3))
    except Exception:
        return pl.BlockSpec(shape, index_map)


# -----------------------------------------------------------------------------
# Kernel 1: row-tiled GroupNorm apply + fused (pre-scaled) QKV projection.
# grid = (B, HW // tr); output is one fused (1, tr, 3C) bf16 block per step.
# -----------------------------------------------------------------------------
def make_norm_qkv_kernel():
    def kernel(x_ref, scale_ref, shift_ref, wqkv_ref, bqkv_ref, qkv_ref):
        x = x_ref[0].astype(jnp.float32)                       # (tr, C)
        # per-(batch, channel) gamma*rstd / (beta - mean*scale), precomputed in XLA
        h = (x * scale_ref[0] + shift_ref[0]).astype(jnp.bfloat16)
        qkv = jnp.dot(h, wqkv_ref[...], preferred_element_type=jnp.float32)  # (tr, 3C)
        qkv_ref[0] = (qkv + bqkv_ref[...]).astype(jnp.bfloat16)
    return kernel


# -----------------------------------------------------------------------------
# Kernel 2a: K/V-resident attention + output projection + residual.
# grid = (B, HW // tq).  K/V are full (HW, C) blocks (DMA'd once per batch).
#   num_kv_tiles == 1  -> single-shot stable softmax (small-HW fast path)
#   num_kv_tiles  > 1  -> in-kernel statically-unrolled online-softmax kv loop
# -----------------------------------------------------------------------------
def make_attn_resident_kernel(C, tkv, num_kv_tiles):
    def kernel(q_ref, k_ref, v_ref, x_ref, wp_ref, bp_ref, o_ref):
        q = q_ref[0]                                           # (tq, C) bf16, pre-scaled
        if num_kv_tiles == 1:
            s = lax.dot_general(q, k_ref[0], (((1,), (1,)), ((), ())),
                                preferred_element_type=jnp.float32)      # (tq, HW)
            m = jnp.max(s, axis=-1, keepdims=True)
            p = jnp.exp(s - m)
            l = jnp.sum(p, axis=-1, keepdims=True)
            acc = jnp.dot(p.astype(jnp.bfloat16), v_ref[0],
                          preferred_element_type=jnp.float32)            # (tq, C)
        else:
            tq = q.shape[0]
            m = jnp.full((tq, 1), -jnp.inf, jnp.float32)
            l = jnp.zeros((tq, 1), jnp.float32)
            acc = jnp.zeros((tq, C), jnp.float32)
            for i in range(num_kv_tiles):                      # static unroll, static slices
                kb = k_ref[0, pl.ds(i * tkv, tkv), :]
                vb = v_ref[0, pl.ds(i * tkv, tkv), :]
                s = lax.dot_general(q, kb, (((1,), (1,)), ((), ())),
                                    preferred_element_type=jnp.float32)  # (tq, tkv)
                m_new = jnp.maximum(m, jnp.max(s, axis=-1, keepdims=True))
                alpha = jnp.exp(m - m_new)
                p = jnp.exp(s - m_new)
                l = alpha * l + jnp.sum(p, axis=-1, keepdims=True)
                acc = alpha * acc + jnp.dot(p.astype(jnp.bfloat16), vb,
                                            preferred_element_type=jnp.float32)
                m = m_new
        a = acc / l                                            # exact normalization
        proj = jnp.dot(a.astype(jnp.bfloat16), wp_ref[...],
                       preferred_element_type=jnp.float32) + bp_ref[...]
        o_ref[0] = (x_ref[0].astype(jnp.float32) + proj).astype(o_ref.dtype)
    return kernel


# -----------------------------------------------------------------------------
# Kernel 2b (fallback, only when K/V residency does not fit VMEM):
# 3-axis grid (B, nq, nk), flash-style online softmax with VMEM scratch carried
# across the innermost kv axis.
# -----------------------------------------------------------------------------
def make_attn_tiled_kernel():
    def kernel(q_ref, k_ref, v_ref, x_ref, wp_ref, bp_ref, o_ref, m_sc, l_sc, acc_sc):
        ki = pl.program_id(2)

        @pl.when(ki == 0)
        def _init():
            m_sc[...] = jnp.full(m_sc.shape, -jnp.inf, jnp.float32)
            l_sc[...] = jnp.zeros(l_sc.shape, jnp.float32)
            acc_sc[...] = jnp.zeros(acc_sc.shape, jnp.float32)

        q = q_ref[0]                                           # (tq, C) bf16, pre-scaled
        s = lax.dot_general(q, k_ref[0], (((1,), (1,)), ((), ())),
                            preferred_element_type=jnp.float32)          # (tq, tkv)
        m_prev = m_sc[...]
        m_new = jnp.maximum(m_prev, jnp.max(s, axis=-1, keepdims=True))
        alpha = jnp.exp(m_prev - m_new)
        p = jnp.exp(s - m_new)
        l_sc[...] = alpha * l_sc[...] + jnp.sum(p, axis=-1, keepdims=True)
        acc_sc[...] = alpha * acc_sc[...] + jnp.dot(
            p.astype(jnp.bfloat16), v_ref[0], preferred_element_type=jnp.float32)
        m_sc[...] = m_new

        @pl.when(ki == pl.num_programs(2) - 1)
        def _finalize():
            a = acc_sc[...] / l_sc[...]
            proj = jnp.dot(a.astype(jnp.bfloat16), wp_ref[...],
                           preferred_element_type=jnp.float32) + bp_ref[...]
            o_ref[0] = (x_ref[0].astype(jnp.float32) + proj).astype(o_ref.dtype)
    return kernel


# ----------------------------------------------------------------------------- wrapper
def attn_block_pallas(x_nchw, params, groups=32, eps=1e-5, *,
                      row_tile=None, tq=None, tkv=None,
                      max_single_pass_hw=1024, force_kv_tiled=False):
    B, C, H, W = x_nchw.shape
    assert C % groups == 0, "GroupNorm requires C % groups == 0"
    # TODO(synk): C not a multiple of 128 would need a non-fused qkv layout (lane-dim
    # block slicing of the fused (HW, 3C) tensor requires a 128-aligned C).
    assert C % 128 == 0
    HW = H * W
    G, Cg = groups, C // groups
    x_dtype = x_nchw.dtype
    itemsize = jnp.dtype(x_dtype).itemsize
    budget = _vmem_budget_bytes()

    # NCHW -> (B, HW, C): channels on the 128-lane axis.
    x = jnp.transpose(x_nchw, (0, 2, 3, 1)).reshape(B, HW, C)

    # ---- GroupNorm statistics: cheap two-pass f32 XLA reduction (per review) -------
    xf = x.astype(jnp.float32).reshape(B, HW, G, Cg)
    mean_g = jnp.mean(xf, axis=(1, 3))                                    # (B, G)
    var_g = jnp.mean(jnp.square(xf - mean_g[:, None, :, None]), axis=(1, 3))
    rstd_g = lax.rsqrt(var_g + eps)
    gamma = params["gn_gamma"].astype(jnp.float32)
    beta = params["gn_beta"].astype(jnp.float32)
    mean_c = jnp.repeat(mean_g, Cg, axis=1)                               # (B, C)
    rstd_c = jnp.repeat(rstd_g, Cg, axis=1)
    scale_bc = rstd_c * gamma[None, :]                                    # gamma * rstd
    shift_bc = beta[None, :] - mean_c * scale_bc
    scale = scale_bc.reshape(B, 1, C)
    shift = shift_bc.reshape(B, 1, C)

    # ---- fused 1x1-conv QKV weights: (C, 3C) bf16; 1/sqrt(C) folded into wq/bq -----
    attn_scale = float(int(C)) ** (-0.5)
    wqkv = jnp.concatenate(
        [params["wq"].T * attn_scale, params["wk"].T, params["wv"].T],
        axis=1).astype(jnp.bfloat16)                                      # (C, 3C)
    bqkv = jnp.concatenate(
        [params["bq"] * attn_scale, params["bk"], params["bv"]]
    ).reshape(1, 3 * C).astype(jnp.float32)
    wp = params["wp"].T.astype(jnp.bfloat16)                              # (C, C)
    bp = params["bp"].reshape(1, C).astype(jnp.float32)

    # ---- Kernel 1: row-tiled GroupNorm apply + fused QKV ---------------------------
    def k1_bytes(t):
        return (2 * t * C * itemsize            # x tile (double-buffered)
                + 2 * t * 3 * C * 2             # fused bf16 qkv out (double-buffered)
                + t * 3 * C * 4                 # f32 matmul result
                + 2 * (3 * C * C * 2 + 3 * C * 4 + 2 * C * 4))  # weights/bias/scale/shift

    tr = row_tile or _pick_divisor_tile(HW, (1024, 512, 256, 128, 64, 32, 16, 8))
    while tr > 8 and k1_bytes(tr) > budget // 2 and HW % (tr // 2) == 0:
        tr //= 2
    assert HW % tr == 0
    nr = HW // tr

    qkv = pl.pallas_call(
        make_norm_qkv_kernel(),
        out_shape=jax.ShapeDtypeStruct((B, HW, 3 * C), jnp.bfloat16),
        grid=(B, nr),
        in_specs=[
            pl.BlockSpec((1, tr, C), lambda b, r: (b, r, 0)),            # x row tile
            pl.BlockSpec((1, 1, C), lambda b, r: (b, 0, 0)),             # scale (b, c)
            pl.BlockSpec((1, 1, C), lambda b, r: (b, 0, 0)),             # shift (b, c)
            pl.BlockSpec((C, 3 * C), lambda b, r: (0, 0)),               # wqkv
            pl.BlockSpec((1, 3 * C), lambda b, r: (0, 0)),               # bqkv
        ],
        out_specs=pl.BlockSpec((1, tr, 3 * C), lambda b, r: (b, r, 0)),
        compiler_params=pltpu.CompilerParams(
            dimension_semantics=("parallel", "parallel"),
            vmem_limit_bytes=budget),
    )(x, scale, shift, wqkv, bqkv)

    # ---- Kernel 2: attention + output projection + residual ------------------------
    tq_ = tq or _pick_divisor_tile(HW, (512, 256, 128, 64, 32, 16, 8))
    tkv_ = tkv or _pick_divisor_tile(HW, (512, 256, 128, 64, 32, 16, 8))
    assert HW % tq_ == 0 and HW % tkv_ == 0
    nq = HW // tq_

    num_kv_tiles = 1 if HW <= max_single_pass_hw else HW // tkv_
    s_cols = HW if num_kv_tiles == 1 else tkv_
    resident_bytes = (4 * HW * C * 2                  # K + V blocks (double-buffered bf16)
                      + 2 * tq_ * C * 2               # q tile (bf16)
                      + 4 * tq_ * C * itemsize        # x residual + out tiles
                      + 2 * (C * C * 2 + C * 4)       # wp / bp
                      + 2 * tq_ * s_cols * 4          # score + p working set
                      + 2 * tq_ * C * 4)              # f32 accumulator + slack
    use_resident = (not force_kv_tiled) and resident_bytes <= int(budget * 0.85)

    if use_resident:
        out = pl.pallas_call(
            make_attn_resident_kernel(C, tkv_, num_kv_tiles),
            out_shape=jax.ShapeDtypeStruct((B, HW, C), x_dtype),
            grid=(B, nq),
            in_specs=[
                pl.BlockSpec((1, tq_, C), lambda b, qi: (b, qi, 0)),     # q slice of qkv
                pl.BlockSpec((1, HW, C), lambda b, qi: (b, 0, 1)),       # K (batch-resident)
                pl.BlockSpec((1, HW, C), lambda b, qi: (b, 0, 2)),       # V (batch-resident)
                pl.BlockSpec((1, tq_, C), lambda b, qi: (b, qi, 0)),     # x residual
                pl.BlockSpec((C, C), lambda b, qi: (0, 0)),              # wp
                pl.BlockSpec((1, C), lambda b, qi: (0, 0)),              # bp
            ],
            out_specs=pl.BlockSpec((1, tq_, C), lambda b, qi: (b, qi, 0)),
            compiler_params=pltpu.CompilerParams(
                dimension_semantics=("parallel", "parallel"),
                vmem_limit_bytes=budget),
        )(qkv, qkv, qkv, x, wp, bp)
    else:
        nk = HW // tkv_
        out = pl.pallas_call(
            make_attn_tiled_kernel(),
            out_shape=jax.ShapeDtypeStruct((B, HW, C), x_dtype),
            grid=(B, nq, nk),
            in_specs=[
                pl.BlockSpec((1, tq_, C), lambda b, qi, ki: (b, qi, 0)),  # q (resident over ki)
                _kv_block_spec((1, tkv_, C), lambda b, qi, ki: (b, ki, 1)),   # k
                _kv_block_spec((1, tkv_, C), lambda b, qi, ki: (b, ki, 2)),   # v
                pl.BlockSpec((1, tq_, C), lambda b, qi, ki: (b, qi, 0)),  # x residual
                pl.BlockSpec((C, C), lambda b, qi, ki: (0, 0)),           # wp
                pl.BlockSpec((1, C), lambda b, qi, ki: (0, 0)),           # bp
            ],
            out_specs=pl.BlockSpec((1, tq_, C), lambda b, qi, ki: (b, qi, 0)),
            scratch_shapes=[
                pltpu.VMEM((tq_, 1), jnp.float32),    # running row max
                pltpu.VMEM((tq_, 1), jnp.float32),    # running row denom
                pltpu.VMEM((tq_, C), jnp.float32),    # output accumulator
            ],
            compiler_params=pltpu.CompilerParams(
                dimension_semantics=("parallel", "parallel", "arbitrary"),
                vmem_limit_bytes=budget),
        )(qkv, qkv, qkv, x, wp, bp)

    return jnp.transpose(out.reshape(B, H, W, C), (0, 3, 1, 2))


# ----------------------------------------------------------------------------- reference
def attn_block_reference(x, params, groups=32, eps=1e-5):
    """Pure-JAX f32 reference mirroring the PyTorch forward (NCHW)."""
    B, C, H, W = x.shape
    xg = x.reshape(B, groups, C // groups, H, W)
    mean = jnp.mean(xg, axis=(2, 3, 4), keepdims=True)
    var = jnp.mean((xg - mean) ** 2, axis=(2, 3, 4), keepdims=True)
    h = ((xg - mean) / jnp.sqrt(var + eps)).reshape(B, C, H, W)
    h = h * params["gn_gamma"][None, :, None, None] + params["gn_beta"][None, :, None, None]

    def conv1x1(t, w, b):
        return jnp.einsum("bchw,oc->bohw", t, w) + b[None, :, None, None]

    q = conv1x1(h, params["wq"], params["bq"])
    k = conv1x1(h, params["wk"], params["bk"])
    v = conv1x1(h, params["wv"], params["bv"])
    q = jnp.transpose(q, (0, 2, 3, 1)).reshape(B, H * W, C)
    k = k.reshape(B, C, H * W)
    w = jnp.einsum("bic,bcj->bij", q, k) * (int(C) ** (-0.5))
    w = jax.nn.softmax(w, axis=-1)
    v = jnp.transpose(v, (0, 2, 3, 1)).reshape(B, H * W, C)
    hh = jnp.einsum("bij,bjc->bic", w, v)
    hh = jnp.transpose(hh.reshape(B, H, W, C), (0, 3, 1, 2))
    hh = conv1x1(hh, params["wp"], params["bp"])
    return x + hh


def init_params(key, C):
    """Deterministic synthetic params matching AttnBlock.__init__ / initialize()."""
    def xavier_uniform(k, fan_in, fan_out, gain=1.0):
        bound = gain * math.sqrt(6.0 / (fan_in + fan_out))
        return jax.random.uniform(k, (fan_out, fan_in), jnp.float32, -bound, bound)

    kq, kk, kv, kp = jax.random.split(key, 4)
    return {
        "gn_gamma": jnp.ones((C,), jnp.float32),
        "gn_beta": jnp.zeros((C,), jnp.float32),
        "wq": xavier_uniform(kq, C, C),
        "bq": jnp.zeros((C,), jnp.float32),
        "wk": xavier_uniform(kk, C, C),
        "bk": jnp.zeros((C,), jnp.float32),
        "wv": xavier_uniform(kv, C, C),
        "bv": jnp.zeros((C,), jnp.float32),
        "wp": xavier_uniform(kp, C, C, gain=1e-5),   # proj re-initialized with gain=1e-5
        "bp": jnp.zeros((C,), jnp.float32),
    }


if __name__ == "__main__":
    # GroupNorm(32, C) requires C % 32 == 0; C=128 keeps the lane dim dense.
    B, C, H, W = 2, 128, 16, 16
    key = jax.random.PRNGKey(0)
    kx, kp, kx2 = jax.random.split(key, 3)
    x = jax.random.normal(kx, (B, C, H, W), jnp.float32)
    params = init_params(kp, C)

    # 1) module-faithful params, default dispatch: K/V-resident single-pass path.
    y = jax.block_until_ready(attn_block_pallas(x, params))
    y_ref = attn_block_reference(x, params)
    np.testing.assert_allclose(np.asarray(y), np.asarray(y_ref), rtol=1e-4, atol=1e-4)

    # 2) Module-faithful init uses proj gain=1e-5, making the attention branch tiny;
    #    rescale wp to O(1) to genuinely stress the bf16 attention path.
    params_stress = dict(params, wp=params["wp"] * 1e5)
    y2 = jax.block_until_ready(attn_block_pallas(x, params_stress))
    y2_ref = attn_block_reference(x, params_stress)
    np.testing.assert_allclose(np.asarray(y2), np.asarray(y2_ref), rtol=5e-2, atol=5e-2)

    # 3) larger spatial shape: exercise the K/V-resident in-kernel online-softmax
    #    kv loop (forced multi-tile via a small single-pass threshold) ...
    x2 = jax.random.normal(kx2, (1, C, 32, 32), jnp.float32)
    y3_ref = attn_block_reference(x2, params_stress)
    y3 = jax.block_until_ready(
        attn_block_pallas(x2, params_stress, max_single_pass_hw=256, tkv=256))
    np.testing.assert_allclose(np.asarray(y3), np.asarray(y3_ref), rtol=5e-2, atol=5e-2)

    # ... and 4) the tiled-kv fallback grid path (only used when residency won't fit).
    y4 = jax.block_until_ready(
        attn_block_pallas(x2, params_stress, force_kv_tiled=True, tq=256, tkv=256))
    np.testing.assert_allclose(np.asarray(y4), np.asarray(y3_ref), rtol=5e-2, atol=5e-2)

    print("KERNEL_OK")
</pallas_src>

<mosaic_0001>
module attributes {stable_mosaic.version = 11 : i64} {
  func.func @kernel(%arg0: i32, %arg1: i32, %arg2: memref<1x256x128xf32, #tpu.memory_space<vmem>>, %arg3: memref<1x1x128xf32, #tpu.memory_space<vmem>>, %arg4: memref<1x1x128xf32, #tpu.memory_space<vmem>>, %arg5: memref<128x384xbf16, #tpu.memory_space<vmem>>, %arg6: memref<1x384xf32, #tpu.memory_space<vmem>>, %arg7: memref<1x256x384xbf16, #tpu.memory_space<vmem>>) attributes {dimension_semantics = [#tpu.dimension_semantics<parallel>, #tpu.dimension_semantics<parallel>], iteration_bounds = array<i64: 2, 1>, scalar_prefetch = 0 : i64, scratch_operands = 0 : i64, tpu.core_type = #tpu.core_type<tc>, window_params = [{transform_indices = @transform_0, window_bounds = array<i64: 1, 256, 128>}, {transform_indices = @transform_1, window_bounds = array<i64: 1, 1, 128>}, {transform_indices = @transform_2, window_bounds = array<i64: 1, 1, 128>}, {pipeline_mode = #tpu.pipeline_mode<synchronous>, transform_indices = @transform_3, window_bounds = array<i64: 128, 384>}, {pipeline_mode = #tpu.pipeline_mode<synchronous>, transform_indices = @transform_4, window_bounds = array<i64: 1, 384>}, {transform_indices = @transform_5, window_bounds = array<i64: 1, 256, 384>}]} {
    %c0 = arith.constant 0 : index
    %c0_0 = arith.constant 0 : index
    %c0_1 = arith.constant 0 : index
    %0 = vector.load %arg2[%c0, %c0_0, %c0_1] : memref<1x256x128xf32, #tpu.memory_space<vmem>>, vector<1x256x128xf32>
    %1 = vector.shape_cast %0 : vector<1x256x128xf32> to vector<256x128xf32>
    %c0_2 = arith.constant 0 : index
    %c0_3 = arith.constant 0 : index
    %c0_4 = arith.constant 0 : index
    %2 = vector.load %arg3[%c0_2, %c0_3, %c0_4] : memref<1x1x128xf32, #tpu.memory_space<vmem>>, vector<1x1x128xf32>
    %3 = vector.shape_cast %2 : vector<1x1x128xf32> to vector<1x128xf32>
    %4 = vector.broadcast %3 : vector<1x128xf32> to vector<256x128xf32>
    %5 = arith.mulf %1, %4 : vector<256x128xf32>
    %c0_5 = arith.constant 0 : index
    %c0_6 = arith.constant 0 : index
    %c0_7 = arith.constant 0 : index
    %6 = vector.load %arg4[%c0_5, %c0_6, %c0_7] : memref<1x1x128xf32, #tpu.memory_space<vmem>>, vector<1x1x128xf32>
    %7 = vector.shape_cast %6 : vector<1x1x128xf32> to vector<1x128xf32>
    %8 = vector.broadcast %7 : vector<1x128xf32> to vector<256x128xf32>
    %9 = arith.addf %5, %8 : vector<256x128xf32>
    %10 = arith.truncf %9 : vector<256x128xf32> to vector<256x128xbf16>
    %c0_8 = arith.constant 0 : index
    %c0_9 = arith.constant 0 : index
    %11 = vector.load %arg5[%c0_8, %c0_9] : memref<128x384xbf16, #tpu.memory_space<vmem>>, vector<128x384xbf16>
    %cst = arith.constant dense<0.000000e+00> : vector<256x384xf32>
    %12 = tpu.matmul %10, %11, %cst {dimension_numbers = #tpu.dot_dimension_numbers<[1], [0], [0], [1], [0, 0, 1, 1], [], []>} : vector<256x128xbf16>, vector<128x384xbf16>, vector<256x384xf32> -> vector<256x384xf32>
    %c0_10 = arith.constant 0 : index
    %c0_11 = arith.constant 0 : index
    %13 = vector.load %arg6[%c0_10, %c0_11] : memref<1x384xf32, #tpu.memory_space<vmem>>, vector<1x384xf32>
    %14 = vector.broadcast %13 : vector<1x384xf32> to vector<256x384xf32>
    %15 = arith.addf %12, %14 : vector<256x384xf32>
    %16 = arith.truncf %15 : vector<256x384xf32> to vector<256x384xbf16>
    %c0_12 = arith.constant 0 : index
    %c0_13 = arith.constant 0 : index
    %c0_14 = arith.constant 0 : index
    %17 = vector.load %arg7[%c0_12, %c0_13, %c0_14] : memref<1x256x384xbf16, #tpu.memory_space<vmem>>, vector<1x256x384xbf16>
    %18 = vector.shape_cast %17 : vector<1x256x384xbf16> to vector<256x384xbf16>
    %19 = vector.shape_cast %16 : vector<256x384xbf16> to vector<1x256x384xbf16>
    tpu.vector_store %arg7[%c0_12, %c0_13, %c0_14], %19 {strides = array<i32>} : memref<1x256x384xbf16, #tpu.memory_space<vmem>>, vector<1x256x384xbf16>,
    return
  }
  func.func @transform_0(%arg0: i32, %arg1: i32) -> (i32, i32, i32) {
    %c0_i32 = arith.constant 0 : i32
    %c0_i32_0 = arith.constant 0 : i32
    return %arg0, %arg1, %c0_i32 : i32, i32, i32
  }
  func.func @transform_1(%arg0: i32, %arg1: i32) -> (i32, i32, i32) {
    %c0_i32 = arith.constant 0 : i32
    %c0_i32_0 = arith.constant 0 : i32
    %c0_i32_1 = arith.constant 0 : i32
    return %arg0, %c0_i32, %c0_i32_0 : i32, i32, i32
  }
  func.func @transform_2(%arg0: i32, %arg1: i32) -> (i32, i32, i32) {
    %c0_i32 = arith.constant 0 : i32
    %c0_i32_0 = arith.constant 0 : i32
    %c0_i32_1 = arith.constant 0 : i32
    return %arg0, %c0_i32, %c0_i32_0 : i32, i32, i32
  }
  func.func @transform_3(%arg0: i32, %arg1: i32) -> (i32, i32) {
    %c0_i32 = arith.constant 0 : i32
    %c0_i32_0 = arith.constant 0 : i32
    %c0_i32_1 = arith.constant 0 : i32
    return %c0_i32, %c0_i32_0 : i32, i32
  }
  func.func @transform_4(%arg0: i32, %arg1: i32) -> (i32, i32) {
    %c0_i32 = arith.constant 0 : i32
    %c0_i32_0 = arith.constant 0 : i32
    %c0_i32_1 = arith.constant 0 : i32
    return %c0_i32, %c0_i32_0 : i32, i32
  }
  func.func @transform_5(%arg0: i32, %arg1: i32) -> (i32, i32, i32) {
    %c0_i32 = arith.constant 0 : i32
    %c0_i32_0 = arith.constant 0 : i32
    return %arg0, %arg1, %c0_i32 : i32, i32, i32
  }
}

</mosaic_0001>

<bundles_post_ra>
// kernel: tpu_custom_call.1
= control target key start
LH: loop header
LB: loop body
LE: loop exit
PB: predicated region body
PF: predicated region fallthrough
CT: control target
= control target key end

     0   :  { %s2242_s0 = inlined_call_operand.hbm [shape: f32[2,256,128], index: 0, kind: input, shape index: {}]   ;;  %s2243_s1 = inlined_call_operand.hbm [shape: f32[2,1,128], index: 1, kind: input, shape index: {}]   ;;  %s2244_s2 = inlined_call_operand.hbm [shape: f32[2,1,128], index: 2, kind: input, shape index: {}]   ;;  %s2245_s3 = inlined_call_operand.hbm [shape: bf16[128,384], index: 3, kind: input, shape index: {}]   ;;  %s2246_s4 = inlined_call_operand.vmem [shape: f32[1,384], index: 4, kind: input, shape index: {}]   ;;  %s2247_s5 = inlined_call_operand.hbm [shape: bf16[2,256,384], index: 5, kind: output, shape index: {}]  }
   0x1   :  { %2254 = sst [smem:[#allocation21_spill]] %s2243_s1 }
   0x2   :  { %2255 = sst [smem:[#allocation22_spill]] %s2245_s3 }
   0x3   :  { %10 = vsyncpa [#allocation3], 0 }
   0x4   :  { %12 = vsyncpa [#allocation3 + $0x1], 0 }
   0x5   :  { %13 = vsyncpa [#allocation6], 0 }
   0x6   :  { %15 = vsyncpa [#allocation6 + $0x1], 0 }
   0x7   :  { %16 = vsyncpa [#allocation9], 0 }
   0x8   :  { %17 = vsyncpa [#allocation4], 0 }
   0x9   :  { %19 = vsyncpa [#allocation4 + $0x1], 0  ;;  %s1684_s18 = smov 0   ;;  %s1686_s19 = smov 0  }
   0xa   :  { %s1688_s20 = smov 0   ;;  %s1690_s21 = smov 0  }
   0xb   :  { %s1692_s22 = smov 0   ;;  %s1694_s23 = smov 0  }
   0xc LB: > { %2256 = sst [smem:[#allocation15_spill]] %s1625_s18  ;;  %s1715_s24 = sadd.s32 4294967295, %s1645_s23   ;;  %s1645_s23 = sphi %s1694_s23, %s25_s23   ;;  %s1641_s22 = sphi %s1692_s22, %s2278_s22   ;;  %s1637_s21 = sphi %s1690_s21, %s2277_s21   ;;  %s1633_s20 = sphi %s1688_s20, %s2273_s20   ;;  %s1629_s19 = sphi %s1686_s19, %s2276_s19   ;;  %s1625_s18 = sphi %s1684_s18, %s2275_s18  }
   0xd   : > { %2257 = sst [smem:[#allocation16_spill]] %s1633_s20  ;;  %s1184_s25 = sadd.s32 4294967294, %s1645_s23  }
   0xe   : > { %2258 = sst [smem:[#allocation17_spill]] %s1645_s23  ;;  %s37_s26 = sadd.s32 1, %s1641_s22 }
   0xf   : > { %s46_s27 = sadd.s32 1, %s1633_s20  ;;  %p39_p0 = scmp.ge.s32.totalorder %s37_s26, 2 }
  0x10   : > { %p53_p1 = scmp.ne.s32.totalorder %s1633_s20, %s1629_s19  ;;  %p54_p2 = scmp.eq.s32.totalorder %s1645_s23, 0 }
  0x11   : > { %p59_p3 = scmp.ne.s32.totalorder %s1629_s19, %s1625_s18  ;;  %s2280_s26 = smov (%p39_p0, %s37_s26), 0 }
  0x12   : > { %2259 = sst [smem:[#allocation18_spill]] %s2280_s26  ;;  %p55_p4 = por %p54_p2, %p53_p1 }
  0x13   : > { %p179_p5 = scmp.eq.s32.totalorder %s1715_s24, 1  ;;  %s41_s28 = ssub.s32 %s1641_s22, %s2280_s26 }
  0x14   : > { %p185_p6 = scmp.eq.s32.totalorder %s1184_s25, 1  ;;  %p44_p7 = scmp.eq.s32.totalorder %s41_s28, 0 }
  0x15   : > { %p1730_p8 = por %p179_p5, %p53_p1  ;;  %p1187_p10 = scmp.ge.s32.totalorder %s1645_s23, 2 }
  0x16   : > { %p1737_p9 = por %p185_p6, %p59_p3  ;;  %p1375_p11 = scmp.lt.s32.totalorder %s1645_s23, 2 }
  0x17   : > { %s1742_s6 = scalar_select %p44_p7, %s1633_s20, %s46_s27  }
  0x18   : > { %s2261_s30 = scalar_select %p1737_p9, 1, 0 }
  0x19   : > { %2263 = sst [smem:[#allocation20_spill]] %s1742_s6  ;;  %s1747_s7 = sand.u32 1, %s1633_s20  }
  0x1a   : > { %2262 = sst [smem:[#allocation19_spill]] %s2261_s30  ;;  %s246_s8 = sand.u32 1, %s1645_s23  }
  0x1b   : > { %p1750_p12 = pnand %p1375_p11, %p55_p4  ;;  %s2265_s1 = sld [smem:[#allocation21_spill]] }
  0x1c   : > { %s249_s14 = scalar_lea.vmem [#allocation5], %s1747_s7  ;;  %s1759_s16 = scalar_lea.sflag [#allocation6], %s246_s8 }
  0x1d   : > { %s256_s15 = sshll.u32 %s249_s14, 4  ;;  %p60_p13 = scmp.eq.s32.totalorder %s1715_s24, 0  ;;  %s257_s15 = int_to_ptr.vmem [resolvable:$true] %s256_s15 }
  0x1e   : > { %p1185_p0 = scmp.ge.s32.totalorder %s1645_s23, 1  ;;  %p192_p1 = scmp.lt.s32.totalorder %s1645_s23, 3 }
  0x1f   : > { %p1772_p2 = por %p60_p13, %p59_p3  ;;  %s2267_s3 = sld [smem:[#allocation22_spill]] }
  0x20   : > { %p1779_p4 = pnand %p1185_p0, %p192_p1  ;;  %s1647_s8 = smov [#allocation8]  }
  0x21   : > { %s252_s12 = scalar_lea.hbm %s2265_s1, %s1641_s22  ;;  %s205_s11 = sshll.u32 %s1647_s8, 4  ;;  %s206_s11 = int_to_ptr.vmem [resolvable:$true] %s205_s11 }
  0x22   : > { %s254_s13 = sshll.u32 %s252_s12, 4  ;;  %p1356_p5 = pneg %p1779_p4  ;;  %s255_s13 = int_to_ptr.hbm [resolvable:$true] %s254_s13 }
  0x23   : > { %1366 = dma.hbm_to_vmem [thread:$0]  (!%p1750_p12), %s255_s13, 16, %s257_s15, %s1759_s16  }
  0x24   : > { %p1357_p3 = pnand %p1356_p5, %p60_p13  ;;  %s1188_s12 = sshll.u32 %s1747_s7, 8 }
  0x25   : > { %s203_s28 = sshll.u32 %s2267_s3, 4  ;;  %s1293_s13 = sshll.u32 %s1641_s22, 8  ;;  %s204_s28 = int_to_ptr.hbm [resolvable:$true] %s203_s28 }
  0x26   : > { %s1648_s14 = smov 192   ;;  %s1649_s15 = smov 12  }
  0x27   : > { %1359 = dma.hbm_to_vmem [thread:$0]  (!%p1357_p3), %s204_s28, 3072, %s206_s11, [#allocation9], %s1648_s14, %s1648_s14, %s1649_s15  }
  0x28   : > { %s233_s1 = scalar_lea.hbm %s2242_s0, %s1293_s13  ;;  %s226_s3 = scalar_lea.vmem [#allocation2], %s1188_s12 }
  0x29   : > { %s236_s26 = sshll.u32 %s226_s3, 4  ;;  %s234_s8 = sshll.u32 %s233_s1, 4  ;;  %s237_s26 = int_to_ptr.vmem [resolvable:$true] %s236_s26  ;;  %s235_s8 = int_to_ptr.hbm [resolvable:$true] %s234_s8 }
  0x2a   : > { %s223_s6 = scalar_lea.sflag [#allocation3], %s1747_s7  ;;  %s1650_s20 = smov 128  }
  0x2b   : > { %s1651_s23 = smov 8   ;;  %s269_s28 = scalar_lea.hbm %s2244_s2, %s1641_s22 }
  0x2c   : > { %1363 = dma.hbm_to_vmem [thread:$0]  (!%p1750_p12), %s235_s8, 4096, %s237_s26, %s223_s6, %s1650_s20, %s1650_s20, %s1651_s23  }
  0x2d   : > { %s266_s11 = scalar_lea.vmem [#allocation7], %s1747_s7  ;;  %s271_s15 = sshll.u32 %s269_s28, 4  ;;  %s272_s15 = int_to_ptr.hbm [resolvable:$true] %s271_s15 }
  0x2e   : > { %s273_s14 = sshll.u32 %s266_s11, 4  ;;  %282 = sbr.rel (%p1779_p4) target bundleno = 417 (0x1a1), region = 40  ;;  %s274_s14 = int_to_ptr.vmem [resolvable:$true] %s273_s14 }
  0x2f   : > { %1369 = dma.hbm_to_vmem [thread:$0]  (!%p1750_p12), %s272_s15, 16, %s274_s14, %s1759_s16  }
  0x30   : > { %s1806_s1 = sand.u32 (!%p1779_p4), 1, %s1629_s19  }
  0x31   : > { %s1192_s3 = sshll.u32 (!%p1779_p4), %s1806_s1, 8  ;;  %s285_s20 = scalar_lea.sflag (!%p1779_p4), [#allocation3], %s1806_s1 }
  0x32   : > { %s1810_s18 = scalar_lea.vmem (!%p1779_p4), [#allocation2], %s1192_s3 }
  0x33   : > { %1608 = dma.done.wait (%p1772_p2), %s285_s20, 4096  }
  0x34   : > { %1610 = vsyncadd (%p1772_p2), %s285_s20, 4294963200  ;;  %s294_s23 = sand.u32 1, %s1715_s24   ;;  %s297_s30 = scalar_lea.vmem [#allocation5], %s1806_s1 }
  0x35   : > { %s295_s26 = scalar_lea.sflag [#allocation6], %s294_s23 }
  0x36   : > { %1612 = dma.done.wait (%p1772_p2), %s295_s26, 32  }
  0x37   : > { %1614 = vsyncadd (%p1772_p2), %s295_s26, 4294967264  ;;  %s306_s6 = scalar_lea.vmem [#allocation7], %s1806_s1 }
  0x38   : > { %1616 = dma.done.wait (%p60_p13), [#allocation9], 3072  }
  0x39   : > { %1618 = vsyncadd (%p60_p13), [#allocation9], 4294964224  ;;  %v1280_v0 = vld [vmem:[#allocation8 + $0xa8] sm:$0xf]  ;;  %v1316_v1 = vld [vmem:[#allocation8 + $0xb0] sm:$0xf0] }
  0x3a   : > { %v1315_v2 = vld [vmem:[#allocation8 + $0xac] sm:$0xf]  ;;  %v1281_v3 = vor.u32 %v1316_v1, %v1280_v0  ;;  %v1282_v4 = vld [vmem:[#allocation8 + $0xb4] sm:$0xf0]  ;;  %v1288_v5 = vld [vmem:[#allocation8 + $0xb0] sm:$0xf] }
  0x3b   : > { %v1317_v6 = vld [vmem:[#allocation8 + $0xb8] sm:$0xf0]  ;;  %v1827_v7 = vor.u32 %v1315_v2, %v1282_v4  ;;  %v1268_v9 = vld [vmem:[#allocation8 + $0x90] sm:$0xf]  ;;  %v1312_v11 = vld [vmem:[#allocation8 + $0x94] sm:$0xf] }
  0x3c   : > { %v1829_v8 = vor.u32 %v1317_v6, %v1288_v5  ;;  %v1313_v10 = vld [vmem:[#allocation8 + $0x98] sm:$0xf0]  ;;  %637 = vmatpush.bf16.msra.mxu0 %v1281_v3  ;;  %1318 = vmatpush.bf16.msra.mxu3 %v1281_v3  ;;  %v1270_v13 = vld [vmem:[#allocation8 + $0x9c] sm:$0xf0]  ;;  %v1276_v14 = vld [vmem:[#allocation8 + $0x98] sm:$0xf] }
  0x3d   : > { %v1269_v12 = vor.u32 %v1313_v10, %v1268_v9  ;;  %v1314_v15 = vld [vmem:[#allocation8 + $0xa0] sm:$0xf0]  ;;  %726 = vmatpush.bf16.msra.mxu1 %v1827_v7  ;;  %v1833_v16 = vor.u32 %v1312_v11, %v1270_v13  ;;  %v1256_v18 = vld [vmem:[#allocation8 + $0x78] sm:$0xf]  ;;  %v1309_v20 = vld [vmem:[#allocation8 + $0x7c] sm:$0xf] }
  0x3e   : > { %815 = vmatpush.bf16.msra.mxu2 %v1829_v8  ;;  %v1835_v17 = vor.u32 %v1314_v15, %v1276_v14  ;;  %v1310_v19 = vld [vmem:[#allocation8 + $0x80] sm:$0xf0]  ;;  %v1258_v21 = vld [vmem:[#allocation8 + $0x84] sm:$0xf0]  ;;  %v1264_v22 = vld [vmem:[#allocation8 + $0x80] sm:$0xf] }
  0x3f   : > { %v1311_v23 = vld [vmem:[#allocation8 + $0x88] sm:$0xf0]  ;;  %v1257_v24 = vor.u32 %v1310_v19, %v1256_v18  ;;  %v1839_v25 = vor.u32 %v1309_v20, %v1258_v21  ;;  %v1244_v27 = vld [vmem:[#allocation8 + $0x60] sm:$0xf]  ;;  %v1306_v29 = vld [vmem:[#allocation8 + $0x64] sm:$0xf] }
  0x40   : > { %638 = vmatpush.bf16.msra.mxu0 %v1269_v12  ;;  %1319 = vmatpush.bf16.msra.mxu3 %v1269_v12  ;;  %v1841_v26 = vor.u32 %v1311_v23, %v1264_v22  ;;  %v1307_v28 = vld [vmem:[#allocation8 + $0x68] sm:$0xf0]  ;;  %v1246_v30 = vld [vmem:[#allocation8 + $0x6c] sm:$0xf0]  ;;  %v1252_v31 = vld [vmem:[#allocation8 + $0x68] sm:$0xf] }
  0x41   : > { %727 = vmatpush.bf16.msra.mxu1 %v1833_v16  ;;  %v1308_v32 = vld [vmem:[#allocation8 + $0x70] sm:$0xf0]  ;;  %v1245_v33 = vor.u32 %v1307_v28, %v1244_v27  ;;  %v1845_v34 = vor.u32 %v1306_v29, %v1246_v30  ;;  %v1232_v36 = vld [vmem:[#allocation8 + $0x48] sm:$0xf]  ;;  %v1303_v38 = vld [vmem:[#allocation8 + $0x4c] sm:$0xf] }
  0x42   : > { %816 = vmatpush.bf16.msra.mxu2 %v1835_v17  ;;  %v1847_v35 = vor.u32 %v1308_v32, %v1252_v31  ;;  %v1304_v37 = vld [vmem:[#allocation8 + $0x50] sm:$0xf0]  ;;  %v1234_v39 = vld [vmem:[#allocation8 + $0x54] sm:$0xf0]  ;;  %v1240_v40 = vld [vmem:[#allocation8 + $0x50] sm:$0xf] }
  0x43   : > { %v1305_v41 = vld [vmem:[#allocation8 + $0x58] sm:$0xf0]  ;;  %v1233_v42 = vor.u32 %v1304_v37, %v1232_v36  ;;  %v1220_v43 = vld [vmem:[#allocation8 + $0x30] sm:$0xf]  ;;  %v1851_v45 = vor.u32 %v1303_v38, %v1234_v39  ;;  %v1300_v47 = vld [vmem:[#allocation8 + $0x34] sm:$0xf] }
  0x44   : > { %639 = vmatpush.bf16.msra.mxu0 %v1257_v24  ;;  %1320 = vmatpush.bf16.msra.mxu3 %v1257_v24  ;;  %v1301_v44 = vld [vmem:[#allocation8 + $0x38] sm:$0xf0]  ;;  %v1853_v46 = vor.u32 %v1305_v41, %v1240_v40  ;;  %v1222_v48 = vld [vmem:[#allocation8 + $0x3c] sm:$0xf0]  ;;  %v1228_v49 = vld [vmem:[#allocation8 + $0x38] sm:$0xf] }
  0x45   : > { %728 = vmatpush.bf16.msra.mxu1 %v1839_v25  ;;  %v1302_v50 = vld [vmem:[#allocation8 + $0x40] sm:$0xf0]  ;;  %v349_v51 = vld [vmem:[%s1810_s18] sm:$0xff]  ;;  %v1221_v53 = vor.u32 %v1301_v44, %v1220_v43  ;;  %v1865_v57 = vor.u32 %v1300_v47, %v1222_v48  ;;  %v1208_v59 = vld [vmem:[#allocation8 + $0x18] sm:$0xf]  ;;  %s1342_s9 = smul.u32 384, %s1806_s1 }
  0x46   : > { %817 = vmatpush.bf16.msra.mxu2 %v1841_v26  ;;  %v1858_v52 = vld [vmem:[%s297_s30] ss:$0 sm:$0xff]  ;;  %v350_v54 = vld [vmem:[%s1810_s18 + $0x8] sm:$0xff]  ;;  %v1867_v58 = vor.u32 %v1302_v50, %v1228_v49  ;;  %v1216_v63 = vld [vmem:[#allocation8 + $0x20] sm:$0xf]  ;;  %s1343_s17 = smul.u32 384, %s1637_s21 }
  0x47   : > { %v373_v55 = vld [vmem:[%s1810_s18 + $0xc0] sm:$0xff]  ;;  %v374_v56 = vld [vmem:[%s1810_s18 + $0xc8] sm:$0xff]  ;;  %v1299_v0 = vld [vmem:[#allocation8 + $0x28] sm:$0xf0]  ;;  %v385_v1 = vmul.f32 %v1858_v52, %v349_v51  ;;  %v386_v2 = vmul.f32 %v1858_v52, %v350_v54  ;;  %s2000_s16 = scalar_lea.vmem [#allocation10], %s1342_s9  ;;  %s1033_s27 = scalar_lea.sflag [#allocation4], %s1806_s1 }
  0x48   : > { %640 = vmatpush.bf16.msra.mxu0 %v1245_v33  ;;  %1321 = vmatpush.bf16.msra.mxu3 %v1245_v33  ;;  %v1298_v60 = vld [vmem:[#allocation8 + $0x20] sm:$0xf0]  ;;  %v1297_v61 = vld [vmem:[#allocation8 + $0x1c] sm:$0xf]  ;;  %v1210_v62 = vld [vmem:[#allocation8 + $0x24] sm:$0xf0]  ;;  %v409_v4 = vmul.f32 %v1858_v52, %v373_v55  ;;  %v410_v5 = vmul.f32 %v1858_v52, %v374_v56  ;;  %v1879_v10 = vor.u32 %v1299_v0, %v1216_v63  ;;  %s1047_s13 = scalar_lea.hbm %s2247_s5, %s1343_s17 }
  0x49   : > { %729 = vmatpush.bf16.msra.mxu1 %v1845_v34  ;;  %v1873_v3 = vld [vmem:[%s306_s6] ss:$0 sm:$0xff]  ;;  %v1209_v6 = vor.u32 %v1298_v60, %v1208_v59  ;;  %v1213_v9 = vor.u32 %v1297_v61, %v1210_v62  ;;  %v1196_v11 = vld [vmem:[#allocation8] sm:$0xf]  ;;  %v1295_v12 = vld [vmem:[#allocation8 + $0x8] sm:$0xf0] }
  0x4a   : > { %818 = vmatpush.bf16.msra.mxu2 %v1847_v35  ;;  %v1294_v13 = vld [vmem:[#allocation8 + $0x4] sm:$0xf]  ;;  %v1198_v14 = vld [vmem:[#allocation8 + $0xc] sm:$0xf0]  ;;  %v1204_v15 = vld [vmem:[#allocation8 + $0x8] sm:$0xf]  ;;  %v421_v19 = vadd.f32 %v1873_v3, %v385_v1  ;;  %v422_v20 = vadd.f32 %v1873_v3, %v386_v2  ;;  %v445_v21 = vadd.f32 %v1873_v3, %v409_v4  ;;  %v446_v22 = vadd.f32 %v1873_v3, %v410_v5 }
  0x4b   : > { %v1296_v18 = vld [vmem:[#allocation8 + $0x10] sm:$0xf0]  ;;  %v1197_v23 = vor.u32 %v1295_v12, %v1196_v11  ;;  %v1201_v24 = vor.u32 %v1294_v13, %v1198_v14  ;;  %v351_v30 = vld [vmem:[%s1810_s18 + $0x10] sm:$0xff]  ;;  %v354_v44 = vld [vmem:[%s1810_s18 + $0x28] sm:$0xff]  ;;  %s1048_s21 = sshll.u32 %s2000_s16, 4  ;;  %s1050_s25 = sshll.u32 %s1047_s13, 4  ;;  %s1049_s21 = int_to_ptr.vmem [resolvable:$true] %s1048_s21  ;;  %s1051_s25 = int_to_ptr.hbm [resolvable:$true] %s1050_s25 }
  0x4c   : > { %641 = vmatpush.bf16.msra.mxu0 %v1233_v42  ;;  %1322 = vmatpush.bf16.msra.mxu3 %v1233_v42  ;;  %v1886_v27 = vor.u32 %v1296_v18, %v1204_v15  ;;  %v453_v28 = vpack.c.bf16 %v422_v20, %v421_v19  ;;  %v1888_v29 = vpack.c.bf16 %v446_v22, %v445_v21  ;;  %v352_v31 = vld [vmem:[%s1810_s18 + $0x18] sm:$0xff]  ;;  %v375_v32 = vld [vmem:[%s1810_s18 + $0xd0] sm:$0xff]  ;;  %v377_v47 = vld [vmem:[%s1810_s18 + $0xe0] sm:$0xff]  ;;  %s1569_s8 = sshra.s32 %s1051_s25, 4  ;;  %s1575_s15 = scalar_lea.hbm %s2247_s5, 768  ;;  %s1570_s8 = int_to_ptr.hbm [resolvable:$true] %s1569_s8 }
  0x4d   : > { %730 = vmatpush.bf16.msra.mxu1 %v1851_v45  ;;  %v376_v33 = vld [vmem:[%s1810_s18 + $0xd8] sm:$0xff]  ;;  %v387_v36 = vmul.f32 %v1858_v52, %v351_v30  ;;  %v388_v37 = vmul.f32 %v1858_v52, %v352_v31  ;;  %v411_v38 = vmul.f32 %v1858_v52, %v375_v32  ;;  %v378_v48 = vld [vmem:[%s1810_s18 + $0xe8] sm:$0xff]  ;;  %v413_v50 = vmul.f32 %v1858_v52, %v377_v47  ;;  %v355_v59 = vld [vmem:[%s1810_s18 + $0x30] sm:$0xff]  ;;  %s1571_s28 = scalar_lea.hbm %s1570_s8, 384  ;;  %p1576_p12 = scmp.lt.s32.totalorder %s1570_s8, %s2247_s5 }
  0x4e   : > { %819 = vmatpush.bf16.msra.mxu2 %v1853_v46  ;;  %v356_v60 = vld [vmem:[%s1810_s18 + $0x38] sm:$0xff]  ;;  %v379_v61 = vld [vmem:[%s1810_s18 + $0xf0] sm:$0xff]  ;;  %v391_v63 = vmul.f32 %v1858_v52, %v355_v59  ;;  %v358_v11 = vld [vmem:[%s1810_s18 + $0x48] sm:$0xff]  ;;  %p1572_p6 = scmp.ne.s32.totalorder %s1570_s8, %s1571_s28  ;;  %p1577_p13 = scmp.lt.s32.totalorder %s1575_s15, %s1571_s28 }
  0x4f   : > { %v423_v39 = vadd.f32 %v1873_v3, %v387_v36  ;;  %v424_v40 = vadd.f32 %v1873_v3, %v388_v37  ;;  %v449_v54 = vadd.f32 %v1873_v3, %v413_v50  ;;  %v380_v62 = vld [vmem:[%s1810_s18 + $0xf8] sm:$0xff]  ;;  %v392_v0 = vmul.f32 %v1858_v52, %v356_v60  ;;  %v361_v22 = vld [vmem:[%s1810_s18 + $0x60] sm:$0xff]  ;;  %v363_v32 = vld [vmem:[%s1810_s18 + $0x70] sm:$0xff] }
  0x50   : > { %642 = vmatpush.bf16.msra.mxu0 %v1221_v53  ;;  %1323 = vmatpush.bf16.msra.mxu3 %v1221_v53  ;;  %v415_v1 = vmul.f32 %v1858_v52, %v379_v61  ;;  %v427_v2 = vadd.f32 %v1873_v3, %v391_v63  ;;  %v360_v15 = vld [vmem:[%s1810_s18 + $0x58] sm:$0xff]  ;;  %v399_v36 = vmul.f32 %v1858_v52, %v363_v32  ;;  %p1573_p7 = pnand %p1572_p6, %p1730_p8  ;;  %p1578_p0 = por %p1577_p13, %p1576_p12 }
  0x51   : > { %731 = vmatpush.bf16.msra.mxu1 %v1865_v57  ;;  %v454_v42 = vpack.c.bf16 %v424_v40, %v423_v39  ;;  %v428_v4 = vadd.f32 %v1873_v3, %v392_v0  ;;  %v365_v40 = vld [vmem:[%s1810_s18 + $0x80] sm:$0xff]  ;;  %v368_v59 = vld [vmem:[%s1810_s18 + $0x98] sm:$0xff] }
  0x52   : > { %820 = vmatpush.bf16.msra.mxu2 %v1867_v58  ;;  %v451_v5 = vadd.f32 %v1873_v3, %v415_v1  ;;  %p1574_p11 = pneg %p1573_p7 }
  0x54   : > { %643 = vmatpush.bf16.msra.mxu0 %v1209_v6  ;;  %1324 = vmatpush.bf16.msra.mxu3 %v1209_v6  ;;  %v456_v6 = vpack.c.bf16 %v428_v4, %v427_v2  ;;  %p1579_p1 = pnand %p1578_p0, %p1574_p11 }
  0x55   : > { %732 = vmatpush.bf16.msra.mxu1 %v1213_v9 }
  0x56   : > { %821 = vmatpush.bf16.msra.mxu2 %v1879_v10 }
  0x58   : > { %644 = vmatpush.bf16.msra.mxu0 %v1197_v23  ;;  %1325 = vmatpush.bf16.msra.mxu3 %v1197_v23  ;;  %v362_v23 = vld [vmem:[%s1810_s18 + $0x68] sm:$0xff] }
  0x59   : > { %733 = vmatpush.bf16.msra.mxu1 %v1201_v24 }
  0x5a   : > { %822 = vmatpush.bf16.msra.mxu2 %v1886_v27 }
  0x5b   : > { %645 = vmatmul.bf16.vlgmr.msra.gmra.mxu0 %v453_v28  ;;  %705 = vmatmul.bf16.vlgmr.msra.gmra.mxu3 %v1888_v29 }
  0x5c   : > { %1326 = vmatpush.bf16.msrb.mxu3 %v1827_v7  ;;  %734 = vmatmul.bf16.vlgmr.msra.gmra.mxu1 %v453_v28  ;;  %v412_v7 = vmul.f32 %v1858_v52, %v376_v33  ;;  %v364_v33 = vld [vmem:[%s1810_s18 + $0x78] sm:$0xff] }
  0x5d   : > { %823 = vmatmul.bf16.vlgmr.msra.gmra.mxu2 %v453_v28  ;;  %v400_v37 = vmul.f32 %v1858_v52, %v364_v33 }
  0x5e   : > { %v448_v41 = vadd.f32 %v1873_v3, %v412_v7 }
  0x5f   : > { %v436_v7 = vadd.f32 %v1873_v3, %v400_v37 }
  0x60   : > { %1327 = vmatpush.bf16.msrb.mxu3 %v1833_v16  ;;  %v447_v16 = vadd.f32 %v1873_v3, %v411_v38  ;;  %v435_v38 = vadd.f32 %v1873_v3, %v399_v36 }
  0x62   : > { %v1908_v43 = vpack.c.bf16 %v448_v41, %v447_v16  ;;  %v460_v39 = vpack.c.bf16 %v436_v7, %v435_v38  ;;  %v366_v16 = vld [vmem:[%s1810_s18 + $0x88] sm:$0xff]  ;;  %v401_v41 = vmul.f32 %v1858_v52, %v365_v40 }
  0x64   : > { %1328 = vmatpush.bf16.msrb.mxu3 %v1839_v25  ;;  %v353_v25 = vld [vmem:[%s1810_s18 + $0x20] sm:$0xff] }
  0x65   : > { %v389_v49 = vmul.f32 %v1858_v52, %v353_v25  ;;  %v501_v25 = vld [vmem:[%s2246_s4] sm:$0x7] }
  0x67   : > { %v425_v51 = vadd.f32 %v1873_v3, %v389_v49  ;;  %v1990_v49 = vperm.slane %v501_v25, 1 }
  0x68   : > { %1329 = vmatpush.bf16.msrb.mxu3 %v1845_v34  ;;  %v390_v34 = vmul.f32 %v1858_v52, %v354_v44  ;;  %v437_v44 = vadd.f32 %v1873_v3, %v401_v41 }
  0x6a   : > { %v426_v53 = vadd.f32 %v1873_v3, %v390_v34 }
  0x6b   : > { %650 = vmatmul.bf16.gmra.mxu0 %v454_v42  ;;  %710 = vmatmul.bf16.gmra.mxu3 %v1908_v43 }
  0x6c   : > { %1330 = vmatpush.bf16.msrb.mxu3 %v1851_v45  ;;  %739 = vmatmul.bf16.gmra.mxu1 %v454_v42  ;;  %v414_v45 = vmul.f32 %v1858_v52, %v378_v48  ;;  %v455_v56 = vpack.c.bf16 %v426_v53, %v425_v51  ;;  %v1988_v48 = vperm.slane %v501_v25, 0 }
  0x6d   : > { %828 = vmatmul.bf16.gmra.mxu2 %v454_v42  ;;  %v402_v42 = vmul.f32 %v1858_v52, %v366_v16 }
  0x6e   : > { %v450_v55 = vadd.f32 %v1873_v3, %v414_v45 }
  0x6f   : > { %v438_v47 = vadd.f32 %v1873_v3, %v402_v42 }
  0x70   : > { %1331 = vmatpush.bf16.msrb.mxu3 %v1865_v57  ;;  %v1925_v57 = vpack.c.bf16 %v450_v55, %v449_v54  ;;  %v1996_v55 = vperm.slane %v501_v25, 2 }
  0x71   : > { %v461_v34 = vpack.c.bf16 %v438_v47, %v437_v44  ;;  %v371_v47 = vld [vmem:[%s1810_s18 + $0xb0] sm:$0xff] }
  0x74   : > { %1332 = vmatpush.bf16.msrb.mxu3 %v1213_v9 }
  0x78   : > { %1333 = vmatpush.bf16.msrb.mxu3 %v1201_v24  ;;  %v397_v24 = vmul.f32 %v1858_v52, %v361_v22 }
  0x7a   : > { %v433_v28 = vadd.f32 %v1873_v3, %v397_v24 }
  0x7b   : > { %655 = vmatmul.bf16.gmra.mxu0 %v455_v56  ;;  %715 = vmatmul.bf16.gmra.mxu3 %v1925_v57 }
  0x7c   : > { %1334 = vmatpush.bf16.msra.mxu3 %v1829_v8  ;;  %744 = vmatmul.bf16.gmra.mxu1 %v455_v56  ;;  %v416_v8 = vmul.f32 %v1858_v52, %v380_v62 }
  0x7d   : > { %833 = vmatmul.bf16.gmra.mxu2 %v455_v56  ;;  %v367_v56 = vld [vmem:[%s1810_s18 + $0x90] sm:$0xff] }
  0x7e   : > { %v403_v62 = vmul.f32 %v1858_v52, %v367_v56 }
  0x80   : > { %1335 = vmatpush.bf16.msra.mxu3 %v1835_v17  ;;  %v452_v17 = vadd.f32 %v1873_v3, %v416_v8 }
  0x82   : > { %v1944_v9 = vpack.c.bf16 %v452_v17, %v451_v5  ;;  %v439_v5 = vadd.f32 %v1873_v3, %v403_v62 }
  0x84   : > { %1336 = vmatpush.bf16.msra.mxu3 %v1841_v26  ;;  %v357_v26 = vld [vmem:[%s1810_s18 + $0x40] sm:$0xff] }
  0x85   : > { %v393_v12 = vmul.f32 %v1858_v52, %v357_v26 }
  0x87   : > { %v429_v13 = vadd.f32 %v1873_v3, %v393_v12 }
  0x88   : > { %1337 = vmatpush.bf16.msra.mxu3 %v1847_v35  ;;  %v394_v35 = vmul.f32 %v1858_v52, %v358_v11 }
  0x8b   : > { %660 = vmatmul.bf16.gmra.mxu0 %v456_v6  ;;  %720 = vmatmul.bf16.gmra.mxu3 %v1944_v9 }
  0x8c   : > { %1338 = vmatpush.bf16.msra.mxu3 %v1853_v46  ;;  %749 = vmatmul.bf16.gmra.mxu1 %v456_v6  ;;  %v430_v46 = vadd.f32 %v1873_v3, %v394_v35 }
  0x8d   : > { %838 = vmatmul.bf16.gmra.mxu2 %v456_v6 }
  0x8e   : > { %v457_v14 = vpack.c.bf16 %v430_v46, %v429_v13 }
  0x90   : > { %1339 = vmatpush.bf16.msra.mxu3 %v1867_v58  ;;  %v359_v58 = vld [vmem:[%s1810_s18 + $0x50] sm:$0xff] }
  0x91   : > { %v395_v18 = vmul.f32 %v1858_v52, %v359_v58 }
  0x93   : > { %v431_v19 = vadd.f32 %v1873_v3, %v395_v18 }
  0x94   : > { %1340 = vmatpush.bf16.msra.mxu3 %v1879_v10  ;;  %v396_v10 = vmul.f32 %v1858_v52, %v360_v15 }
  0x96   : > { %v432_v20 = vadd.f32 %v1873_v3, %v396_v10  ;;  %v369_v10 = vld [vmem:[%s1810_s18 + $0xa0] sm:$0xff] }
  0x97   : > { %v405_v22 = vmul.f32 %v1858_v52, %v369_v10 }
  0x98   : > { %1341 = vmatpush.bf16.msra.mxu3 %v1886_v27  ;;  %v458_v21 = vpack.c.bf16 %v432_v20, %v431_v19  ;;  %v398_v27 = vmul.f32 %v1858_v52, %v362_v23  ;;  %v370_v19 = vld [vmem:[%s1810_s18 + $0xa8] sm:$0xff] }
  0x99   : > { %v406_v23 = vmul.f32 %v1858_v52, %v370_v19  ;;  %v441_v32 = vadd.f32 %v1873_v3, %v405_v22 }
  0x9a   : > { %v434_v30 = vadd.f32 %v1873_v3, %v398_v27 }
  0x9b   : > { %665 = vmatmul.bf16.gmra.mxu0 %v457_v14  ;;  %794 = vmatmul.bf16.vlgmr.msrb.gmra.mxu3 %v1888_v29  ;;  %v442_v33 = vadd.f32 %v1873_v3, %v406_v23 }
  0x9c   : > { %754 = vmatmul.bf16.gmra.mxu1 %v457_v14  ;;  %v459_v31 = vpack.c.bf16 %v434_v30, %v433_v28 }
  0x9d   : > { %843 = vmatmul.bf16.gmra.mxu2 %v457_v14  ;;  %v463_v7 = vpack.c.bf16 %v442_v33, %v441_v32 }
  0xab   : > { %670 = vmatmul.bf16.gmra.mxu0 %v458_v21  ;;  %799 = vmatmul.bf16.gmra.mxu3 %v1908_v43 }
  0xac   : > { %759 = vmatmul.bf16.gmra.mxu1 %v458_v21 }
  0xad   : > { %848 = vmatmul.bf16.gmra.mxu2 %v458_v21 }
  0xbb   : > { %675 = vmatmul.bf16.gmra.mxu0 %v459_v31  ;;  %804 = vmatmul.bf16.gmra.mxu3 %v1925_v57 }
  0xbc   : > { %764 = vmatmul.bf16.gmra.mxu1 %v459_v31 }
  0xbd   : > { %853 = vmatmul.bf16.gmra.mxu2 %v459_v31 }
  0xcb   : > { %680 = vmatmul.bf16.gmra.mxu0 %v460_v39  ;;  %809 = vmatmul.bf16.gmra.mxu3 %v1944_v9 }
  0xcc   : > { %769 = vmatmul.bf16.gmra.mxu1 %v460_v39 }
  0xcd   : > { %858 = vmatmul.bf16.gmra.mxu2 %v460_v39 }
  0xd8   : > { %v646_v50 = vpop.f32.mrf.mxu0 }
  0xd9   : > { %v647_v45 = vadd.f32 %v646_v50, %v1988_v48  ;;  %v735_v51 = vpop.f32.mrf.mxu1 }
  0xda   : > { %v736_v53 = vadd.f32 %v735_v51, %v1990_v49  ;;  %v407_v51 = vmul.f32 %v1858_v52, %v371_v47 }
  0xdb   : > { %685 = vmatmul.bf16.gmra.mxu0 %v461_v34  ;;  %883 = vmatmul.bf16.vlgmr.msra.gmra.mxu3 %v1888_v29  ;;  %v404_v29 = vmul.f32 %v1858_v52, %v368_v59 }
  0xdc   : > { %v904_v54 = vpack.c.bf16 %v736_v53, %v647_v45  ;;  %774 = vmatmul.bf16.gmra.mxu1 %v461_v34 }
  0xdd   : > { %863 = vmatmul.bf16.gmra.mxu2 %v461_v34  ;;  %v440_v17 = vadd.f32 %v1873_v3, %v404_v29  ;;  %v372_v34 = vld [vmem:[%s1810_s18 + $0xb8] sm:$0xff]  ;;  %v443_v29 = vadd.f32 %v1873_v3, %v407_v51 }
  0xde   : > { %968 = vst [vmem:[%s2000_s16] sm:$0xff] %v904_v54  ;;  %v2003_v60 = vpop.f32.mrf.mxu3  ;;  %v408_v53 = vmul.f32 %v1858_v52, %v372_v34 }
  0xdf   : > { %v462_v12 = vpack.c.bf16 %v440_v17, %v439_v5 }
  0xe0   : > { %v824_v61 = vpop.f32.mrf.mxu2  ;;  %v648_v0 = vpop.f32.mrf.mxu0 }
  0xe1   : > { %v825_v63 = vadd.f32 %v824_v61, %v1996_v55  ;;  %v649_v1 = vadd.f32 %v648_v0, %v1988_v48  ;;  %v737_v8 = vpop.f32.mrf.mxu1 }
  0xe2   : > { %v738_v4 = vadd.f32 %v737_v8, %v1990_v49 }
  0xe3   : > { %v905_v2 = vpack.c.bf16 %v825_v63, %v825_v63  ;;  %v444_v63 = vadd.f32 %v1873_v3, %v408_v53 }
  0xe4   : > { %v906_v6 = vpack.c.bf16 %v738_v4, %v649_v1 }
  0xe5   : > { %969 = vst [vmem:[%s2000_s16 + $0x8] sm:$0xf] %v905_v2  ;;  %v464_v8 = vpack.c.bf16 %v444_v63, %v443_v29 }
  0xe6   : > { %970 = vst [vmem:[%s2000_s16 + $0xc] sm:$0xff] %v906_v6  ;;  %v2014_v26 = vpop.f32.mrf.mxu3 }
  0xe8   : > { %v826_v11 = vpop.f32.mrf.mxu2  ;;  %v651_v13 = vpop.f32.mrf.mxu0 }
  0xe9   : > { %v827_v35 = vadd.f32 %v826_v11, %v1996_v55  ;;  %v652_v46 = vadd.f32 %v651_v13, %v1988_v48  ;;  %v740_v14 = vpop.f32.mrf.mxu1 }
  0xea   : > { %v741_v15 = vadd.f32 %v740_v14, %v1990_v49 }
  0xeb   : > { %v907_v58 = vpack.c.bf16 %v827_v35, %v827_v35  ;;  %690 = vmatmul.bf16.gmra.mxu0 %v462_v12  ;;  %888 = vmatmul.bf16.gmra.mxu3 %v1908_v43 }
  0xec   : > { %v908_v18 = vpack.c.bf16 %v741_v15, %v652_v46  ;;  %779 = vmatmul.bf16.gmra.mxu1 %v462_v12 }
  0xed   : > { %971 = vst [vmem:[%s2000_s16 + $0x14] sm:$0xf] %v907_v58  ;;  %868 = vmatmul.bf16.gmra.mxu2 %v462_v12 }
  0xee   : > { %972 = vst [vmem:[%s2000_s16 + $0x18] sm:$0xff] %v908_v18  ;;  %v2024_v20 = vpop.f32.mrf.mxu3 }
  0xf0   : > { %v829_v21 = vpop.f32.mrf.mxu2  ;;  %v653_v27 = vpop.f32.mrf.mxu0 }
  0xf1   : > { %v830_v24 = vadd.f32 %v829_v21, %v1996_v55  ;;  %v654_v43 = vadd.f32 %v653_v27, %v1988_v48  ;;  %v742_v28 = vpop.f32.mrf.mxu1 }
  0xf2   : > { %v743_v31 = vadd.f32 %v742_v28, %v1990_v49 }
  0xf3   : > { %v909_v30 = vpack.c.bf16 %v830_v24, %v830_v24 }
  0xf4   : > { %v910_v36 = vpack.c.bf16 %v743_v31, %v654_v43  ;;  %v707_v31 = vadd.f32 %v2003_v60, %v1988_v48 }
  0xf5   : > { %973 = vst [vmem:[%s2000_s16 + $0x20] sm:$0xf] %v909_v30 }
  0xf6   : > { %974 = vst [vmem:[%s2000_s16 + $0x24] sm:$0xff] %v910_v36  ;;  %v2035_v37 = vpop.f32.mrf.mxu3 }
  0xf8   : > { %v831_v38 = vpop.f32.mrf.mxu2  ;;  %v656_v40 = vpop.f32.mrf.mxu0 }
  0xf9   : > { %v832_v39 = vadd.f32 %v831_v38, %v1996_v55  ;;  %v657_v16 = vadd.f32 %v656_v40, %v1988_v48  ;;  %v745_v41 = vpop.f32.mrf.mxu1 }
  0xfa   : > { %v746_v25 = vadd.f32 %v745_v41, %v1990_v49 }
  0xfb   : > { %v911_v42 = vpack.c.bf16 %v832_v39, %v832_v39  ;;  %695 = vmatmul.bf16.gmra.mxu0 %v463_v7  ;;  %893 = vmatmul.bf16.gmra.mxu3 %v1925_v57 }
  0xfc   : > { %v912_v44 = vpack.c.bf16 %v746_v25, %v657_v16  ;;  %784 = vmatmul.bf16.gmra.mxu1 %v463_v7  ;;  %v709_v25 = vadd.f32 %v2014_v26, %v1988_v48 }
  0xfd   : > { %975 = vst [vmem:[%s2000_s16 + $0x2c] sm:$0xf] %v911_v42  ;;  %873 = vmatmul.bf16.gmra.mxu2 %v463_v7 }
  0xfe   : > { %976 = vst [vmem:[%s2000_s16 + $0x30] sm:$0xff] %v912_v44  ;;  %v2045_v50 = vpop.f32.mrf.mxu3 }
 0x100   : > { %v834_v45 = vpop.f32.mrf.mxu2  ;;  %v658_v56 = vpop.f32.mrf.mxu0 }
 0x101   : > { %v835_v54 = vadd.f32 %v834_v45, %v1996_v55  ;;  %v659_v57 = vadd.f32 %v658_v56, %v1988_v48  ;;  %v747_v59 = vpop.f32.mrf.mxu1 }
 0x102   : > { %v748_v62 = vadd.f32 %v747_v59, %v1990_v49 }
 0x103   : > { %v913_v61 = vpack.c.bf16 %v835_v54, %v835_v54 }
 0x104   : > { %v914_v0 = vpack.c.bf16 %v748_v62, %v659_v57 }
 0x105   : > { %977 = vst [vmem:[%s2000_s16 + $0x38] sm:$0xf] %v913_v61  ;;  %v712_v61 = vadd.f32 %v2024_v20, %v1988_v48 }
 0x106   : > { %978 = vst [vmem:[%s2000_s16 + $0x3c] sm:$0xff] %v914_v0  ;;  %v2056_v1 = vpop.f32.mrf.mxu3 }
 0x108   : > { %v836_v52 = vpop.f32.mrf.mxu2  ;;  %v661_v4 = vpop.f32.mrf.mxu0 }
 0x109   : > { %v837_v2 = vadd.f32 %v836_v52, %v1996_v55  ;;  %v662_v5 = vadd.f32 %v661_v4, %v1988_v48  ;;  %v750_v17 = vpop.f32.mrf.mxu1 }
 0x10a   : > { %v751_v11 = vadd.f32 %v750_v17, %v1990_v49 }
 0x10b   : > { %v915_v6 = vpack.c.bf16 %v837_v2, %v837_v2  ;;  %700 = vmatmul.bf16.gmra.mxu0 %v464_v8  ;;  %898 = vmatmul.bf16.gmra.mxu3 %v1944_v9 }
 0x10c   : > { %v916_v3 = vpack.c.bf16 %v751_v11, %v662_v5  ;;  %789 = vmatmul.bf16.gmra.mxu1 %v464_v8 }
 0x10d   : > { %979 = vst [vmem:[%s2000_s16 + $0x44] sm:$0xf] %v915_v6  ;;  %878 = vmatmul.bf16.gmra.mxu2 %v464_v8  ;;  %v714_v6 = vadd.f32 %v2035_v37, %v1988_v48 }
 0x10e   : > { %980 = vst [vmem:[%s2000_s16 + $0x48] sm:$0xff] %v916_v3  ;;  %v2064_v12 = vpop.f32.mrf.mxu3 }
 0x110   : > { %v839_v35 = vpop.f32.mrf.mxu2  ;;  %v663_v46 = vpop.f32.mrf.mxu0 }
 0x111   : > { %v840_v13 = vadd.f32 %v839_v35, %v1996_v55  ;;  %v664_v14 = vadd.f32 %v663_v46, %v1988_v48  ;;  %v752_v58 = vpop.f32.mrf.mxu1 }
 0x112   : > { %v753_v9 = vadd.f32 %v752_v58, %v1990_v49 }
 0x113   : > { %v917_v15 = vpack.c.bf16 %v840_v13, %v840_v13 }
 0x114   : > { %v918_v18 = vpack.c.bf16 %v753_v9, %v664_v14 }
 0x115   : > { %981 = vst [vmem:[%s2000_s16 + $0x50] sm:$0xf] %v917_v15 }
 0x116   : > { %982 = vst [vmem:[%s2000_s16 + $0x54] sm:$0xff] %v918_v18  ;;  %v2071_v10 = vpop.f32.mrf.mxu3 }
 0x118   : > { %v841_v19 = vpop.f32.mrf.mxu2  ;;  %v666_v22 = vpop.f32.mrf.mxu0 }
 0x119   : > { %v842_v21 = vadd.f32 %v841_v19, %v1996_v55  ;;  %v667_v23 = vadd.f32 %v666_v22, %v1988_v48  ;;  %v755_v24 = vpop.f32.mrf.mxu1  ;;  %v717_v19 = vadd.f32 %v2045_v50, %v1988_v48 }
 0x11a   : > { %v756_v43 = vadd.f32 %v755_v24, %v1990_v49 }
 0x11b   : > { %v919_v27 = vpack.c.bf16 %v842_v21, %v842_v21 }
 0x11c   : > { %v920_v28 = vpack.c.bf16 %v756_v43, %v667_v23 }
 0x11d   : > { %983 = vst [vmem:[%s2000_s16 + $0x5c] sm:$0xf] %v919_v27 }
 0x11e   : > { %984 = vst [vmem:[%s2000_s16 + $0x60] sm:$0xff] %v920_v28  ;;  %v795_v30 = vpop.f32.mrf.mxu3 }
 0x11f   : > { %v796_v32 = vadd.f32 %v795_v30, %v1990_v49 }
 0x120   : > { %v844_v33 = vpop.f32.mrf.mxu2  ;;  %v668_v38 = vpop.f32.mrf.mxu0 }
 0x121   : > { %v845_v36 = vadd.f32 %v844_v33, %v1996_v55  ;;  %v952_v7 = vpack.c.bf16 %v796_v32, %v707_v31  ;;  %v669_v39 = vadd.f32 %v668_v38, %v1988_v48  ;;  %v757_v40 = vpop.f32.mrf.mxu1  ;;  %v719_v33 = vadd.f32 %v2056_v1, %v1988_v48 }
 0x122   : > { %v758_v41 = vadd.f32 %v757_v40, %v1990_v49 }
 0x123   : > { %v921_v16 = vpack.c.bf16 %v845_v36, %v845_v36  ;;  %1016 = vst [vmem:[%s2000_s16 + $0x120] sm:$0xff] %v952_v7 }
 0x124   : > { %v922_v42 = vpack.c.bf16 %v758_v41, %v669_v39 }
 0x125   : > { %985 = vst [vmem:[%s2000_s16 + $0x68] sm:$0xf] %v921_v16 }
 0x126   : > { %986 = vst [vmem:[%s2000_s16 + $0x6c] sm:$0xff] %v922_v42  ;;  %v797_v60 = vpop.f32.mrf.mxu3 }
 0x127   : > { %v798_v44 = vadd.f32 %v797_v60, %v1990_v49 }
 0x128   : > { %v846_v47 = vpop.f32.mrf.mxu2  ;;  %v671_v45 = vpop.f32.mrf.mxu0 }
 0x129   : > { %v847_v34 = vadd.f32 %v846_v47, %v1996_v55  ;;  %v954_v51 = vpack.c.bf16 %v798_v44, %v709_v25  ;;  %v672_v53 = vadd.f32 %v671_v45, %v1988_v48  ;;  %v760_v54 = vpop.f32.mrf.mxu1  ;;  %v722_v44 = vadd.f32 %v2064_v12, %v1988_v48 }
 0x12a   : > { %v761_v57 = vadd.f32 %v760_v54, %v1990_v49 }
 0x12b   : > { %v923_v56 = vpack.c.bf16 %v847_v34, %v847_v34  ;;  %1018 = vst [vmem:[%s2000_s16 + $0x12c] sm:$0xff] %v954_v51 }
 0x12c   : > { %v924_v59 = vpack.c.bf16 %v761_v57, %v672_v53 }
 0x12d   : > { %987 = vst [vmem:[%s2000_s16 + $0x74] sm:$0xf] %v923_v56 }
 0x12e   : > { %988 = vst [vmem:[%s2000_s16 + $0x78] sm:$0xff] %v924_v59  ;;  %v800_v26 = vpop.f32.mrf.mxu3 }
 0x12f   : > { %v801_v62 = vadd.f32 %v800_v26, %v1990_v49 }
 0x130   : > { %v849_v29 = vpop.f32.mrf.mxu2  ;;  %v673_v0 = vpop.f32.mrf.mxu0 }
 0x131   : > { %v850_v63 = vadd.f32 %v849_v29, %v1996_v55  ;;  %v956_v52 = vpack.c.bf16 %v801_v62, %v712_v61  ;;  %v674_v8 = vadd.f32 %v673_v0, %v1988_v48  ;;  %v762_v2 = vpop.f32.mrf.mxu1  ;;  %v724_v61 = vadd.f32 %v2071_v10, %v1988_v48 }
 0x132   : > { %v763_v5 = vadd.f32 %v762_v2, %v1990_v49 }
 0x133   : > { %v925_v4 = vpack.c.bf16 %v850_v63, %v850_v63  ;;  %1020 = vst [vmem:[%s2000_s16 + $0x138] sm:$0xff] %v956_v52 }
 0x134   : > { %v926_v17 = vpack.c.bf16 %v763_v5, %v674_v8 }
 0x135   : > { %989 = vst [vmem:[%s2000_s16 + $0x80] sm:$0xf] %v925_v4 }
 0x136   : > { %990 = vst [vmem:[%s2000_s16 + $0x84] sm:$0xff] %v926_v17  ;;  %v802_v20 = vpop.f32.mrf.mxu3 }
 0x137   : > { %v803_v11 = vadd.f32 %v802_v20, %v1990_v49 }
 0x138   : > { %v851_v3 = vpop.f32.mrf.mxu2  ;;  %v676_v13 = vpop.f32.mrf.mxu0 }
 0x139   : > { %v852_v35 = vadd.f32 %v851_v3, %v1996_v55  ;;  %v958_v46 = vpack.c.bf16 %v803_v11, %v714_v6  ;;  %v677_v14 = vadd.f32 %v676_v13, %v1988_v48  ;;  %v765_v58 = vpop.f32.mrf.mxu1 }
 0x13a   : > { %v766_v9 = vadd.f32 %v765_v58, %v1990_v49 }
 0x13b   : > { %v927_v15 = vpack.c.bf16 %v852_v35, %v852_v35  ;;  %1022 = vst [vmem:[%s2000_s16 + $0x144] sm:$0xff] %v958_v46 }
 0x13c   : > { %v928_v18 = vpack.c.bf16 %v766_v9, %v677_v14 }
 0x13d   : > { %991 = vst [vmem:[%s2000_s16 + $0x8c] sm:$0xf] %v927_v15 }
 0x13e   : > { %992 = vst [vmem:[%s2000_s16 + $0x90] sm:$0xff] %v928_v18  ;;  %v805_v37 = vpop.f32.mrf.mxu3 }
 0x13f   : > { %v806_v21 = vadd.f32 %v805_v37, %v1990_v49 }
 0x140   : > { %v854_v22 = vpop.f32.mrf.mxu2  ;;  %v678_v24 = vpop.f32.mrf.mxu0 }
 0x141   : > { %v855_v23 = vadd.f32 %v854_v22, %v1996_v55  ;;  %v960_v27 = vpack.c.bf16 %v806_v21, %v717_v19  ;;  %v679_v43 = vadd.f32 %v678_v24, %v1988_v48  ;;  %v767_v28 = vpop.f32.mrf.mxu1 }
 0x142   : > { %v768_v31 = vadd.f32 %v767_v28, %v1990_v49 }
 0x143   : > { %v929_v30 = vpack.c.bf16 %v855_v23, %v855_v23  ;;  %1024 = vst [vmem:[%s2000_s16 + $0x150] sm:$0xff] %v960_v27 }
 0x144   : > { %v930_v32 = vpack.c.bf16 %v768_v31, %v679_v43 }
 0x145   : > { %993 = vst [vmem:[%s2000_s16 + $0x98] sm:$0xf] %v929_v30 }
 0x146   : > { %994 = vst [vmem:[%s2000_s16 + $0x9c] sm:$0xff] %v930_v32  ;;  %v807_v50 = vpop.f32.mrf.mxu3 }
 0x147   : > { %v808_v36 = vadd.f32 %v807_v50, %v1990_v49 }
 0x148   : > { %v856_v38 = vpop.f32.mrf.mxu2  ;;  %v681_v39 = vpop.f32.mrf.mxu0 }
 0x149   : > { %v857_v7 = vadd.f32 %v856_v38, %v1996_v55  ;;  %v962_v40 = vpack.c.bf16 %v808_v36, %v719_v33  ;;  %v682_v16 = vadd.f32 %v681_v39, %v1988_v48  ;;  %v770_v41 = vpop.f32.mrf.mxu1 }
 0x14a   : > { %v771_v60 = vadd.f32 %v770_v41, %v1990_v49 }
 0x14b   : > { %v931_v42 = vpack.c.bf16 %v857_v7, %v857_v7  ;;  %1026 = vst [vmem:[%s2000_s16 + $0x15c] sm:$0xff] %v962_v40 }
 0x14c   : > { %v932_v25 = vpack.c.bf16 %v771_v60, %v682_v16 }
 0x14d   : > { %995 = vst [vmem:[%s2000_s16 + $0xa4] sm:$0xf] %v931_v42 }
 0x14e   : > { %996 = vst [vmem:[%s2000_s16 + $0xa8] sm:$0xff] %v932_v25  ;;  %v810_v1 = vpop.f32.mrf.mxu3 }
 0x14f   : > { %v811_v47 = vadd.f32 %v810_v1, %v1990_v49 }
 0x150   : > { %v859_v34 = vpop.f32.mrf.mxu2  ;;  %v683_v51 = vpop.f32.mrf.mxu0 }
 0x151   : > { %v860_v45 = vadd.f32 %v859_v34, %v1996_v55  ;;  %v964_v53 = vpack.c.bf16 %v811_v47, %v722_v44  ;;  %v684_v54 = vadd.f32 %v683_v51, %v1988_v48  ;;  %v772_v56 = vpop.f32.mrf.mxu1 }
 0x152   : > { %v773_v59 = vadd.f32 %v772_v56, %v1990_v49 }
 0x153   : > { %v933_v57 = vpack.c.bf16 %v860_v45, %v860_v45  ;;  %1028 = vst [vmem:[%s2000_s16 + $0x168] sm:$0xff] %v964_v53 }
 0x154   : > { %v934_v26 = vpack.c.bf16 %v773_v59, %v684_v54 }
 0x155   : > { %997 = vst [vmem:[%s2000_s16 + $0xb0] sm:$0xf] %v933_v57 }
 0x156   : > { %998 = vst [vmem:[%s2000_s16 + $0xb4] sm:$0xff] %v934_v26  ;;  %v812_v12 = vpop.f32.mrf.mxu3 }
 0x157   : > { %v813_v62 = vadd.f32 %v812_v12, %v1990_v49 }
 0x158   : > { %v861_v29 = vpop.f32.mrf.mxu2  ;;  %v686_v0 = vpop.f32.mrf.mxu0 }
 0x159   : > { %v862_v63 = vadd.f32 %v861_v29, %v1996_v55  ;;  %v966_v52 = vpack.c.bf16 %v813_v62, %v724_v61  ;;  %v687_v8 = vadd.f32 %v686_v0, %v1988_v48  ;;  %v775_v2 = vpop.f32.mrf.mxu1 }
 0x15a   : > { %v776_v5 = vadd.f32 %v775_v2, %v1990_v49 }
 0x15b   : > { %v935_v4 = vpack.c.bf16 %v862_v63, %v862_v63  ;;  %1030 = vst [vmem:[%s2000_s16 + $0x174] sm:$0xff] %v966_v52 }
 0x15c   : > { %v936_v17 = vpack.c.bf16 %v776_v5, %v687_v8 }
 0x15d   : > { %999 = vst [vmem:[%s2000_s16 + $0xbc] sm:$0xf] %v935_v4 }
 0x15e   : > { %1000 = vst [vmem:[%s2000_s16 + $0xc0] sm:$0xff] %v936_v17  ;;  %v884_v10 = vpop.f32.mrf.mxu3 }
 0x15f   : > { %v885_v6 = vadd.f32 %v884_v10, %v1996_v55 }
 0x160   : > { %v864_v20 = vpop.f32.mrf.mxu2  ;;  %v688_v3 = vpop.f32.mrf.mxu0 }
 0x161   : > { %v865_v11 = vadd.f32 %v864_v20, %v1996_v55  ;;  %v953_v35 = vpack.c.bf16 %v885_v6, %v885_v6  ;;  %v689_v13 = vadd.f32 %v688_v3, %v1988_v48  ;;  %v777_v46 = vpop.f32.mrf.mxu1 }
 0x162   : > { %v778_v58 = vadd.f32 %v777_v46, %v1990_v49 }
 0x163   : > { %v937_v14 = vpack.c.bf16 %v865_v11, %v865_v11  ;;  %1017 = vst [vmem:[%s2000_s16 + $0x128] sm:$0xf] %v953_v35 }
 0x164   : > { %v938_v15 = vpack.c.bf16 %v778_v58, %v689_v13 }
 0x165   : > { %1001 = vst [vmem:[%s2000_s16 + $0xc8] sm:$0xf] %v937_v14 }
 0x166   : > { %1002 = vst [vmem:[%s2000_s16 + $0xcc] sm:$0xff] %v938_v15  ;;  %v886_v9 = vpop.f32.mrf.mxu3 }
 0x167   : > { %v887_v37 = vadd.f32 %v886_v9, %v1996_v55 }
 0x168   : > { %v866_v18 = vpop.f32.mrf.mxu2  ;;  %v691_v21 = vpop.f32.mrf.mxu0 }
 0x169   : > { %v867_v19 = vadd.f32 %v866_v18, %v1996_v55  ;;  %v955_v22 = vpack.c.bf16 %v887_v37, %v887_v37  ;;  %v692_v23 = vadd.f32 %v691_v21, %v1988_v48  ;;  %v780_v24 = vpop.f32.mrf.mxu1 }
 0x16a   : > { %v781_v43 = vadd.f32 %v780_v24, %v1990_v49 }
 0x16b   : > { %v939_v27 = vpack.c.bf16 %v867_v19, %v867_v19  ;;  %1019 = vst [vmem:[%s2000_s16 + $0x134] sm:$0xf] %v955_v22 }
 0x16c   : > { %v940_v28 = vpack.c.bf16 %v781_v43, %v692_v23 }
 0x16d   : > { %1003 = vst [vmem:[%s2000_s16 + $0xd4] sm:$0xf] %v939_v27 }
 0x16e   : > { %1004 = vst [vmem:[%s2000_s16 + $0xd8] sm:$0xff] %v940_v28  ;;  %v889_v30 = vpop.f32.mrf.mxu3 }
 0x16f   : > { %v890_v32 = vadd.f32 %v889_v30, %v1996_v55 }
 0x170   : > { %v869_v31 = vpop.f32.mrf.mxu2  ;;  %v693_v33 = vpop.f32.mrf.mxu0 }
 0x171   : > { %v870_v50 = vadd.f32 %v869_v31, %v1996_v55  ;;  %v957_v36 = vpack.c.bf16 %v890_v32, %v890_v32  ;;  %v694_v38 = vadd.f32 %v693_v33, %v1988_v48  ;;  %v782_v7 = vpop.f32.mrf.mxu1 }
 0x172   : > { %v783_v40 = vadd.f32 %v782_v7, %v1990_v49 }
 0x173   : > { %v941_v39 = vpack.c.bf16 %v870_v50, %v870_v50  ;;  %1021 = vst [vmem:[%s2000_s16 + $0x140] sm:$0xf] %v957_v36 }
 0x174   : > { %v942_v16 = vpack.c.bf16 %v783_v40, %v694_v38 }
 0x175   : > { %1005 = vst [vmem:[%s2000_s16 + $0xe0] sm:$0xf] %v941_v39 }
 0x176   : > { %1006 = vst [vmem:[%s2000_s16 + $0xe4] sm:$0xff] %v942_v16  ;;  %v891_v41 = vpop.f32.mrf.mxu3 }
 0x177   : > { %v892_v60 = vadd.f32 %v891_v41, %v1996_v55 }
 0x178   : > { %v871_v42 = vpop.f32.mrf.mxu2  ;;  %v696_v1 = vpop.f32.mrf.mxu0 }
 0x179   : > { %v872_v25 = vadd.f32 %v871_v42, %v1996_v55  ;;  %v959_v44 = vpack.c.bf16 %v892_v60, %v892_v60  ;;  %v697_v47 = vadd.f32 %v696_v1, %v1988_v48  ;;  %v785_v34 = vpop.f32.mrf.mxu1 }
 0x17a   : > { %v786_v51 = vadd.f32 %v785_v34, %v1990_v49 }
 0x17b   : > { %v943_v45 = vpack.c.bf16 %v872_v25, %v872_v25  ;;  %1023 = vst [vmem:[%s2000_s16 + $0x14c] sm:$0xf] %v959_v44 }
 0x17c   : > { %v944_v53 = vpack.c.bf16 %v786_v51, %v697_v47 }
 0x17d   : > { %1007 = vst [vmem:[%s2000_s16 + $0xec] sm:$0xf] %v943_v45 }
 0x17e   : > { %1008 = vst [vmem:[%s2000_s16 + $0xf0] sm:$0xff] %v944_v53  ;;  %v894_v54 = vpop.f32.mrf.mxu3 }
 0x17f   : > { %v895_v57 = vadd.f32 %v894_v54, %v1996_v55 }
 0x180   : > { %v874_v56 = vpop.f32.mrf.mxu2  ;;  %v698_v26 = vpop.f32.mrf.mxu0 }
 0x181   : > { %v875_v59 = vadd.f32 %v874_v56, %v1996_v55  ;;  %v961_v12 = vpack.c.bf16 %v895_v57, %v895_v57  ;;  %v699_v61 = vadd.f32 %v698_v26, %v1988_v48  ;;  %v787_v62 = vpop.f32.mrf.mxu1 }
 0x182   : > { %v788_v63 = vadd.f32 %v787_v62, %v1990_v49 }
 0x183   : > { %v945_v29 = vpack.c.bf16 %v875_v59, %v875_v59  ;;  %1025 = vst [vmem:[%s2000_s16 + $0x158] sm:$0xf] %v961_v12 }
 0x184   : > { %v946_v0 = vpack.c.bf16 %v788_v63, %v699_v61 }
 0x185   : > { %1009 = vst [vmem:[%s2000_s16 + $0xf8] sm:$0xf] %v945_v29 }
 0x186   : > { %1010 = vst [vmem:[%s2000_s16 + $0xfc] sm:$0xff] %v946_v0  ;;  %v896_v52 = vpop.f32.mrf.mxu3 }
 0x187   : > { %v897_v2 = vadd.f32 %v896_v52, %v1996_v55 }
 0x188   : > { %v876_v8 = vpop.f32.mrf.mxu2  ;;  %v701_v5 = vpop.f32.mrf.mxu0 }
 0x189   : > { %v877_v4 = vadd.f32 %v876_v8, %v1996_v55  ;;  %v963_v17 = vpack.c.bf16 %v897_v2, %v897_v2  ;;  %v702_v10 = vadd.f32 %v701_v5, %v1988_v48  ;;  %v790_v20 = vpop.f32.mrf.mxu1 }
 0x18a   : > { %v791_v11 = vadd.f32 %v790_v20, %v1990_v49 }
 0x18b   : > { %v947_v6 = vpack.c.bf16 %v877_v4, %v877_v4  ;;  %1027 = vst [vmem:[%s2000_s16 + $0x164] sm:$0xf] %v963_v17 }
 0x18c   : > { %v948_v3 = vpack.c.bf16 %v791_v11, %v702_v10 }
 0x18d   : > { %1011 = vst [vmem:[%s2000_s16 + $0x104] sm:$0xf] %v947_v6 }
 0x18e   : > { %1012 = vst [vmem:[%s2000_s16 + $0x108] sm:$0xff] %v948_v3  ;;  %v899_v35 = vpop.f32.mrf.mxu3 }
 0x18f   : > { %v900_v46 = vadd.f32 %v899_v35, %v1996_v55 }
 0x190   : > { %v879_v13 = vpop.f32.mrf.mxu2  ;;  %v703_v58 = vpop.f32.mrf.mxu0 }
 0x191   : > { %v880_v14 = vadd.f32 %v879_v13, %v1996_v55  ;;  %v965_v15 = vpack.c.bf16 %v900_v46, %v900_v46  ;;  %v704_v9 = vadd.f32 %v703_v58, %v1988_v48  ;;  %v792_v18 = vpop.f32.mrf.mxu1 }
 0x192   : > { %v793_v19 = vadd.f32 %v792_v18, %v1990_v49 }
 0x193   : > { %v949_v37 = vpack.c.bf16 %v880_v14, %v880_v14  ;;  %1029 = vst [vmem:[%s2000_s16 + $0x170] sm:$0xf] %v965_v15 }
 0x194   : > { %v950_v21 = vpack.c.bf16 %v793_v19, %v704_v9 }
 0x195   : > { %1013 = vst [vmem:[%s2000_s16 + $0x110] sm:$0xf] %v949_v37 }
 0x196   : > { %1014 = vst [vmem:[%s2000_s16 + $0x114] sm:$0xff] %v950_v21  ;;  %v901_v22 = vpop.f32.mrf.mxu3 }
 0x197   : > { %v902_v23 = vadd.f32 %v901_v22, %v1996_v55 }
 0x198   : > { %v881_v48 = vpop.f32.mrf.mxu2 }
 0x199   : > { %v882_v49 = vadd.f32 %v881_v48, %v1996_v55  ;;  %v967_v24 = vpack.c.bf16 %v902_v23, %v902_v23 }
 0x19b   : > { %v951_v27 = vpack.c.bf16 %v882_v49, %v882_v49  ;;  %1031 = vst [vmem:[%s2000_s16 + $0x17c] sm:$0xf] %v967_v24 }
 0x19d   : > { %1015 = vst [vmem:[%s2000_s16 + $0x11c] sm:$0xf] %v951_v27 }
 0x19e   : > { %1582 = shalt.err (!%p1579_p1)
}
 0x19f   : > { %s1652_s1 = smov 192   ;;  %s1653_s18 = smov 12  }
 0x1a0   : > { %1354 = dma.vmem_to_hbm [thread:$0]  (%p1730_p8), %s1049_s21, 6144, %s1051_s25, %s1033_s27, %s1652_s1, %s1652_s1, %s1653_s18  }
 0x1a1 PF: > { %s2269_s23 = sld [smem:[#allocation15_spill]]  ;;  %p1371_p2 = pnand %p1187_p10, %p1737_p9 }
 0x1a2   : > { %s2271_s30 = sld [smem:[#allocation17_spill]] }
 0x1a3   : > { %p1372_p4 = pneg %p1371_p2 }
 0x1a7   : > { %s1065_s6 = sand.u32 1, %s2269_s23  }
 0x1a8   : > { %s1066_s24 = scalar_lea.sflag [#allocation4], %s1065_s6 }
 0x1a9   : > { %1620 = dma.done.wait (%p1372_p4), %s1066_s24, 6144  }
 0x1aa   : > { %1622 = vsyncadd (%p1372_p4), %s1066_s24, 4294961152  ;;  %s25_s23 = sadd.s32 1, %s2271_s30   ;;  %s2272_s7 = sld [smem:[#allocation16_spill]] }
 0x1ab   : > { %p22_p5 = scmp.ge.s32.totalorder %s25_s23, 4   ;;  %s2273_s20 = sld [smem:[#allocation20_spill]] }
 0x1ac   : > { %s2274_s29 = sld [smem:[#allocation18_spill]]  ;;  %s2275_s18 = smov %s1629_s19 }
 0x1ad   : > { %s2277_s21 = smov %s1641_s22 }
 0x1ae   :  { %24 = sbr.rel (!%p22_p5) target bundleno = 12 (0xc), region = 113 }
 0x1b0   : > { %s2276_s19 = smov %s2272_s7 }
 0x1b2   : > { %s2278_s22 = smov %s2274_s29 }
 0x1b3   :  { %1072 = vsyncpa [#allocation3], 1 }
 0x1b4   :  { %1074 = vsyncpa [#allocation3 + $0x1], 1 }
 0x1b5   :  { %1075 = vsyncpa [#allocation6], 1 }
 0x1b6   :  { %1077 = vsyncpa [#allocation6 + $0x1], 1 }
 0x1b7   :  { %1078 = vsyncpa [#allocation9], 1 }
 0x1b8   :  { %1079 = vsyncpa [#allocation4], 1 }
 0x1b9   :  { %1081 = vsyncpa [#allocation4 + $0x1], 1 }

</bundles_post_ra>
